<compile_context>
chip_gen: v6e
topology: v6e:2x2x1
jax: 0.10.0
libtpu: 0.0.40
codegen_flags: <defaults>
</compile_context>

<pallas_src>
import functools
import math

import jax
import jax.numpy as jnp
from jax import lax
from jax.experimental import pallas as pl
from jax.experimental.pallas import tpu as pltpu

# ---- "CFG" equivalents (synthetic, small) ----------------------------------
DIM_IN = 32          # dim_in
PROJECTION_DIM = 64  # CFG.projection_dim
DROPOUT_P = 0.1      # CFG.dropout
BATCH = 8

_VMEM_TILE_BUDGET = 48 * 1024 * 1024   # v7x-safe working-set budget for tiles
_VMEM_LIMIT_CAP = 56 * 1024 * 1024     # never request more scoped VMEM than this


def _round_up(n: int, m: int) -> int:
    return ((n + m - 1) // m) * m


def _uniform_bits(seed_u32, row0_u32, shape, dim_out):
    """Stateless per-element u32 hash (murmur3 fmix32) from portable jnp ops."""
    rows = lax.broadcasted_iota(jnp.uint32, shape, 0) + row0_u32
    cols = lax.broadcasted_iota(jnp.uint32, shape, 1)
    x = rows * jnp.uint32(dim_out) + cols               # global element index
    x = x * jnp.uint32(0xCC9E2D51)
    x = x ^ (seed_u32 * jnp.uint32(0x9E3779B1))          # decorrelate seeds
    x = x ^ (x >> jnp.uint32(16))
    x = x * jnp.uint32(0x85EBCA6B)
    x = x ^ (x >> jnp.uint32(13))
    x = x * jnp.uint32(0xC2B2AE35)
    x = x ^ (x >> jnp.uint32(16))
    return x


def _linear_gelu(x_ref, w_ref, b_ref, *, mxu_dtype, approximate):
    """x @ W + b followed by GELU.  MXU in mxu_dtype (W pre-cast), f32 epilogue."""
    x = x_ref[...]
    if mxu_dtype is not None and x.dtype != mxu_dtype:
        x = x.astype(mxu_dtype)
    y = jnp.dot(x, w_ref[...], preferred_element_type=jnp.float32)
    y = y + b_ref[...].astype(jnp.float32)
    if approximate:
        # tanh form -> EUP (otherwise-idle VLIW slot); ~1e-3 off torch default.
        y = jax.nn.gelu(y, approximate=True)
    else:
        # Exact erf GELU, matching torch.nn.GELU().
        y = 0.5 * y * (1.0 + lax.erf(y * (1.0 / math.sqrt(2.0))))
    return y


def _proj_eval_kernel(x_ref, w_ref, b_ref, o_ref, *, mxu_dtype, approximate):
    y = _linear_gelu(x_ref, w_ref, b_ref, mxu_dtype=mxu_dtype,
                     approximate=approximate)
    o_ref[...] = y.reshape(o_ref.shape).astype(o_ref.dtype)


def _proj_train_kernel(seed_ref, x_ref, w_ref, b_ref, o_ref, *,
                       tile_b, dim_out, dropout_p, mxu_dtype, approximate):
    y = _linear_gelu(x_ref, w_ref, b_ref, mxu_dtype=mxu_dtype,
                     approximate=approximate)
    # Inverted dropout with a stateless hash: bits only for the real dim_out
    # lanes (no padded lanes exist anymore), mask independent of tiling.
    row0 = (pl.program_id(0) * tile_b).astype(jnp.uint32)
    bits = _uniform_bits(seed_ref[0].astype(jnp.uint32), row0, y.shape, dim_out)
    thresh = jnp.uint32(min(int(dropout_p * (2 ** 32)), 2 ** 32 - 1))
    keep = bits >= thresh                                  # P(keep) = 1 - p
    y = jnp.where(keep, y * (1.0 / (1.0 - dropout_p)), 0.0)
    o_ref[...] = y.reshape(o_ref.shape).astype(o_ref.dtype)


def projection_head(x, w, b, *, dropout_p=DROPOUT_P, training=False, seed=0,
                    tile_b=4096, mxu_dtype=None, out_dtype=None,
                    approximate=False):
    """ProjectionHead forward: GELU(x @ W + b) with optional inverted dropout.

    x: (B, dim_in); w: (dim_in, dim_out); b: (dim_out,) or (1, dim_out).
    """
    B, dim_in = x.shape
    d = w.shape[1]
    out_dtype = x.dtype if out_dtype is None else jnp.dtype(out_dtype)
    b2 = jnp.reshape(b, (1, d))
    if mxu_dtype is not None:
        w = w.astype(mxu_dtype)   # cast once here; callers should cache this

    # --- output layout: lane-dense without padding HBM ----------------------
    if d % 128 == 0:
        pack, quantum = False, 8                 # already lane dense
    else:
        q = 1024 // math.gcd(d, 1024)            # rows per (8,128) packed block
        if B % q == 0:
            pack, quantum = True, q              # (tb,d) -> (tb*d/128,128) store
        else:
            pack, quantum = False, 8             # direct (masked) store, no pad

    # --- batch tile, capped to a v7x-safe VMEM working set ------------------
    in_sz = x.dtype.itemsize
    out_sz = jnp.dtype(out_dtype).itemsize
    per_row = (2 * dim_in * in_sz + 2 * d * out_sz          # double-buffered x/out
               + (6 if training else 3) * d * 4)            # f32 temporaries
    max_rows = max(quantum, (_VMEM_TILE_BUDGET // per_row) // quantum * quantum)
    tb = _round_up(max(int(tile_b), quantum), quantum)
    tb = min(tb, _round_up(B, quantum), max_rows)
    grid = (pl.cdiv(B, tb),)

    vmem_needed = (per_row * tb
                   + 2 * (dim_in * d * w.dtype.itemsize + d * 4)
                   + (1 << 20))
    vmem_limit = int(min(max(vmem_needed, 16 << 20), _VMEM_LIMIT_CAP))
    cparams = pltpu.CompilerParams(dimension_semantics=("parallel",),
                                   vmem_limit_bytes=vmem_limit)

    x_spec = pl.BlockSpec((tb, dim_in), lambda i, *_: (i, 0))
    w_spec = pl.BlockSpec((dim_in, d), lambda i, *_: (0, 0))   # VMEM-resident
    b_spec = pl.BlockSpec((1, d), lambda i, *_: (0, 0))        # VMEM-resident
    if pack:
        out_shape = jax.ShapeDtypeStruct((B * d // 128, 128), out_dtype)
        out_spec = pl.BlockSpec((tb * d // 128, 128), lambda i, *_: (i, 0))
    else:
        out_shape = jax.ShapeDtypeStruct((B, d), out_dtype)
        out_spec = pl.BlockSpec((tb, d), lambda i, *_: (i, 0))

    if training and dropout_p > 0.0:
        kernel = functools.partial(_proj_train_kernel, tile_b=tb, dim_out=d,
                                   dropout_p=float(dropout_p),
                                   mxu_dtype=mxu_dtype, approximate=approximate)
        seed_arr = jnp.asarray([seed], dtype=jnp.int32)
        out = pl.pallas_call(
            kernel,
            out_shape=out_shape,
            grid_spec=pltpu.PrefetchScalarGridSpec(
                num_scalar_prefetch=1,                    # seed lands in SMEM
                grid=grid,
                in_specs=[x_spec, w_spec, b_spec],
                out_specs=out_spec,
            ),
            compiler_params=cparams,
        )(seed_arr, x, w, b2)
    else:
        kernel = functools.partial(_proj_eval_kernel, mxu_dtype=mxu_dtype,
                                   approximate=approximate)
        out = pl.pallas_call(
            kernel,
            out_shape=out_shape,
            grid_spec=pl.GridSpec(grid=grid,
                                  in_specs=[x_spec, w_spec, b_spec],
                                  out_specs=out_spec),
            compiler_params=cparams,
        )(x, w, b2)

    if pack:
        out = out.reshape(B, d)   # free: (B*d/128,128) and (B,d) are bit-identical
    return out


def _reference_eval(x, w, b):
    """Plain-JAX reference: Linear -> exact GELU (dropout is identity in eval)."""
    y = (x.astype(jnp.float32) @ w.astype(jnp.float32)
         + jnp.reshape(b, (1, -1)).astype(jnp.float32))
    return 0.5 * y * (1.0 + lax.erf(y / jnp.sqrt(2.0)))


if __name__ == "__main__":
    key = jax.random.PRNGKey(0)
    kx, kw, kb, kx2 = jax.random.split(key, 4)

    # Deterministic init mimicking nn.Linear: U(-1/sqrt(dim_in), 1/sqrt(dim_in))
    bound = 1.0 / math.sqrt(DIM_IN)
    w = jax.random.uniform(kw, (DIM_IN, PROJECTION_DIM), jnp.float32,
                           minval=-bound, maxval=bound)
    b = jax.random.uniform(kb, (PROJECTION_DIM,), jnp.float32,
                           minval=-bound, maxval=bound)

    # (1) Eval-mode forward at the module's nominal size (single tile).
    x = jax.random.normal(kx, (BATCH, DIM_IN), dtype=jnp.float32)
    out = jax.block_until_ready(projection_head(x, w, b, training=False))
    ref = _reference_eval(x, w, b)
    assert out.shape == (BATCH, PROJECTION_DIM)
    assert jnp.allclose(out, ref, atol=1e-5, rtol=1e-5), "eval mismatch"

    # (2) Multi-tile eval: batch grid axis (3 tiles of 16 rows), resident W/b,
    #     lane-dense packed store (16,64)->(8,128) per tile, no pad / no slice.
    x2 = jax.random.normal(kx2, (48, DIM_IN), dtype=jnp.float32)
    out2 = jax.block_until_ready(
        projection_head(x2, w, b, training=False, tile_b=16))
    ref2 = _reference_eval(x2, w, b)
    assert out2.shape == (48, PROJECTION_DIM)
    assert jnp.allclose(out2, ref2, atol=1e-5, rtol=1e-5), "tiled eval mismatch"

    # (3) Training-mode: fused inverted dropout (stateless hash PRNG).
    # TODO(synk): torch's RNG stream cannot be bit-matched on TPU; the mask
    # differs from torch even with the same seed (expected-value semantics match).
    out3 = jax.block_until_ready(
        projection_head(x2, w, b, training=True, seed=123, tile_b=16))
    assert out3.shape == (48, PROJECTION_DIM)
    assert bool(jnp.all(jnp.isfinite(out3)))
    kept_ok = jnp.isclose(out3, ref2 / (1.0 - DROPOUT_P), atol=1e-5, rtol=1e-5)
    assert bool(jnp.all(kept_ok | (out3 == 0.0))), "dropout scaling mismatch"
    drop_frac = float(jnp.mean((out3 == 0.0).astype(jnp.float32)))
    assert 0.02 < drop_frac < 0.25, f"dropout fraction {drop_frac} off"

    print("KERNEL_OK")
</pallas_src>

<mosaic_0001>
module attributes {stable_mosaic.version = 11 : i64} {
  func.func @_proj_eval_kernel(%arg0: i32, %arg1: memref<8x32xf32, #tpu.memory_space<vmem>>, %arg2: memref<32x64xf32, #tpu.memory_space<vmem>>, %arg3: memref<1x64xf32, #tpu.memory_space<vmem>>, %arg4: memref<8x64xf32, #tpu.memory_space<vmem>>) attributes {dimension_semantics = [#tpu.dimension_semantics<parallel>], iteration_bounds = array<i64: 1>, scalar_prefetch = 0 : i64, scratch_operands = 0 : i64, tpu.core_type = #tpu.core_type<tc>, window_params = [{transform_indices = @transform_0, window_bounds = array<i64: 8, 32>}, {pipeline_mode = #tpu.pipeline_mode<synchronous>, transform_indices = @transform_1, window_bounds = array<i64: 32, 64>}, {pipeline_mode = #tpu.pipeline_mode<synchronous>, transform_indices = @transform_2, window_bounds = array<i64: 1, 64>}, {transform_indices = @transform_3, window_bounds = array<i64: 8, 64>}]} {
    %c0 = arith.constant 0 : index
    %c0_0 = arith.constant 0 : index
    %0 = vector.load %arg1[%c0, %c0_0] : memref<8x32xf32, #tpu.memory_space<vmem>>, vector<8x32xf32>
    %c0_1 = arith.constant 0 : index
    %c0_2 = arith.constant 0 : index
    %1 = vector.load %arg2[%c0_1, %c0_2] : memref<32x64xf32, #tpu.memory_space<vmem>>, vector<32x64xf32>
    %cst = arith.constant dense<0.000000e+00> : vector<8x64xf32>
    %2 = tpu.matmul %0, %1, %cst {dimension_numbers = #tpu.dot_dimension_numbers<[1], [0], [0], [1], [0, 0, 1, 1], [], []>} : vector<8x32xf32>, vector<32x64xf32>, vector<8x64xf32> -> vector<8x64xf32>
    %c0_3 = arith.constant 0 : index
    %c0_4 = arith.constant 0 : index
    %3 = vector.load %arg3[%c0_3, %c0_4] : memref<1x64xf32, #tpu.memory_space<vmem>>, vector<1x64xf32>
    %4 = vector.broadcast %3 : vector<1x64xf32> to vector<8x64xf32>
    %5 = arith.addf %2, %4 : vector<8x64xf32>
    %cst_5 = arith.constant 5.000000e-01 : f32
    %6 = vector.broadcast %cst_5 : f32 to vector<8x64xf32>
    %7 = arith.mulf %6, %5 : vector<8x64xf32>
    %cst_6 = arith.constant 0.707106769 : f32
    %8 = vector.broadcast %cst_6 : f32 to vector<8x64xf32>
    %9 = arith.mulf %5, %8 : vector<8x64xf32>
    %10 = math.erf %9 : vector<8x64xf32>
    %cst_7 = arith.constant 1.000000e+00 : f32
    %11 = vector.broadcast %cst_7 : f32 to vector<8x64xf32>
    %12 = arith.addf %11, %10 : vector<8x64xf32>
    %13 = arith.mulf %7, %12 : vector<8x64xf32>
    %c0_8 = arith.constant 0 : index
    %c0_9 = arith.constant 0 : index
    %14 = vector.load %arg4[%c0_8, %c0_9] : memref<8x64xf32, #tpu.memory_space<vmem>>, vector<8x64xf32>
    tpu.vector_store %arg4[%c0_8, %c0_9], %13 {strides = array<i32>} : memref<8x64xf32, #tpu.memory_space<vmem>>, vector<8x64xf32>,
    return
  }
  func.func @transform_0(%arg0: i32) -> (i32, i32) {
    %c0_i32 = arith.constant 0 : i32
    %c0_i32_0 = arith.constant 0 : i32
    return %arg0, %c0_i32 : i32, i32
  }
  func.func @transform_1(%arg0: i32) -> (i32, i32) {
    %c0_i32 = arith.constant 0 : i32
    %c0_i32_0 = arith.constant 0 : i32
    %c0_i32_1 = arith.constant 0 : i32
    return %c0_i32, %c0_i32_0 : i32, i32
  }
  func.func @transform_2(%arg0: i32) -> (i32, i32) {
    %c0_i32 = arith.constant 0 : i32
    %c0_i32_0 = arith.constant 0 : i32
    %c0_i32_1 = arith.constant 0 : i32
    return %c0_i32, %c0_i32_0 : i32, i32
  }
  func.func @transform_3(%arg0: i32) -> (i32, i32) {
    %c0_i32 = arith.constant 0 : i32
    %c0_i32_0 = arith.constant 0 : i32
    return %arg0, %c0_i32 : i32, i32
  }
}

</mosaic_0001>

<bundles_post_ra>
// kernel: tpu_custom_call.1
= control target key start
LH: loop header
LB: loop body
LE: loop exit
PB: predicated region body
PF: predicated region fallthrough
CT: control target
= control target key end

     0   :  { %8 = vsyncpa [#allocation3], 0  ;;  %s282_s0 = inlined_call_operand.hbm [shape: f32[8,32], index: 0, kind: input, shape index: {}]   ;;  %s283_s1 = inlined_call_operand.hbm [shape: f32[32,64], index: 1, kind: input, shape index: {}]   ;;  %s284_s2 = inlined_call_operand.vmem [shape: f32[1,64], index: 2, kind: input, shape index: {}]   ;;  %s285_s3 = inlined_call_operand.hbm [shape: f32[8,64], index: 3, kind: output, shape index: {}]  }
   0x1   :  { %9 = vsyncpa [#allocation6], 0 }
   0x2   :  { %10 = vsyncpa [#allocation4], 0  ;;  %s243_s12 = smov [#allocation2]   ;;  %s244_s14 = smov [#allocation5]  }
   0x3   :  { %s17_s13 = sshll.u32 %s243_s12, 4  ;;  %s26_s15 = sshll.u32 %s244_s14, 4  ;;  %s18_s13 = int_to_ptr.vmem [resolvable:$true] %s17_s13  ;;  %s27_s15 = int_to_ptr.vmem [resolvable:$true] %s26_s15 }
   0x4   :  { %s185_s16 = scalar_lea.vmem %s18_s13, 128  ;;  %p190_p1 = scmp.lt.s32.totalorder %s18_s13, %s18_s13 }
   0x5   :  { %p186_p0 = scmp.ne.s32.totalorder %s18_s13, %s185_s16  ;;  %p191_p2 = scmp.lt.s32.totalorder %s185_s16, %s185_s16 }
   0x7   :  { %p192_p3 = por %p191_p2, %p190_p1 }
   0x9   :  { %p193_p4 = pnand %p192_p3, %p186_p0 }
   0xb   :  { %196 = shalt.err (!%p193_p4)
}
   0xc   :  { %20 = dma.hbm_to_vmem [thread:$0]  %s282_s0, 128, %s18_s13, [#allocation3]  }
   0xd   :  { %s205_s19 = scalar_lea.vmem %s27_s15, 512  ;;  %p210_p6 = scmp.lt.s32.totalorder %s27_s15, %s27_s15 }
   0xe   :  { %p206_p5 = scmp.ne.s32.totalorder %s27_s15, %s205_s19  ;;  %p211_p7 = scmp.lt.s32.totalorder %s205_s19, %s205_s19 }
  0x10   :  { %p212_p8 = por %p211_p7, %p210_p6 }
  0x12   :  { %p213_p9 = pnand %p212_p8, %p206_p5 }
  0x14   :  { %216 = shalt.err (!%p213_p9)
}
  0x15   :  { %s245_s20 = smov 128   ;;  %s246_s21 = smov 8  }
  0x16   :  { %32 = dma.hbm_to_vmem [thread:$0]  %s283_s1, 512, %s27_s15, [#allocation6], %s245_s20, %s245_s20, %s246_s21  }
  0x17   :  { %237 = dma.done.wait [#allocation3], 128  }
  0x18   :  { %238 = vsyncadd [#allocation3], 4294967168 }
  0x19   :  { %239 = dma.done.wait [#allocation6], 512  }
  0x1a   :  { %240 = vsyncadd [#allocation6], 4294966784  ;;  %v247_v0 = vmov 0.0   ;;  %vm248_vm0 = vmmov 0   ;;  %v45_v1 = vld [vmem:[#allocation5 + $0x18] sm:$0xff]  ;;  %v44_v2 = vld [vmem:[#allocation5 + $0x10] sm:$0xff] }
  0x1b   :  { %157 = vmatprep.subr.mxu0 %v247_v0  ;;  %165 = vmatprep.mubr.msk.f32.mxu0 %vm248_vm0, %v247_v0  ;;  %v43_v3 = vld [vmem:[#allocation5 + $0x8] sm:$0xff]  ;;  %v42_v4 = vld [vmem:[#allocation5] sm:$0xff]  ;;  %v41_v5 = vld [vmem:[#allocation2] sm:$0xff]  ;;  %vm53_vm1 = vcmask 261120   ;;  %s249_s24 = smov [#allocation7]   ;;  %vm132_vm2 = vcmask 523264  }
  0x1c   :  { %158 = vmatpush3.msra.mxu0 %v45_v1  ;;  %v150_v6 = vld [vmem:[%s284_s2] ss:$0 sm:$0xff]  ;;  %s140_s25 = sshll.u32 %s249_s24, 4  ;;  %s141_s25 = int_to_ptr.vmem [resolvable:$true] %s140_s25 }
  0x1d   :  { %159 = vmatprep.subr.mxu0 %v247_v0  ;;  %s217_s26 = scalar_lea.vmem %s141_s25, 128  ;;  %p222_p11 = scmp.lt.s32.totalorder %s141_s25, %s141_s25 }
  0x1e   :  { %160 = vmatpush3.msra.mxu0 %v44_v2  ;;  %p218_p10 = scmp.ne.s32.totalorder %s141_s25, %s217_s26  ;;  %p223_p12 = scmp.lt.s32.totalorder %s217_s26, %s217_s26 }
  0x1f   :  { %161 = vmatprep.subr.mxu0 %v247_v0 }
  0x20   :  { %162 = vmatpush3.msra.mxu0 %v43_v3  ;;  %p224_p13 = por %p223_p12, %p222_p11 }
  0x21   :  { %163 = vmatprep.subr.mxu0 %v247_v0 }
  0x22   :  { %164 = vmatpush3.msra.mxu0 %v42_v4  ;;  %p225_p0 = pnand %p224_p13, %p218_p10 }
  0x23   :  { %166 = vmatmul.mubr.msk.f32.vlgmr.msra.gmra.mxu0 %vm53_vm1, %v41_v5 }
  0xe3   :  { %v123_v7 = vpop.f32.mrf.mxu0 }
  0xe4   :  { %v124_v8 = vadd.f32 %v150_v6, %v123_v7 }
  0xe5   :  { %v167_v9 = vpop.f32.mrf.mxu0 }
  0xe6   :  { %v128_v10 = vmul.f32 0.70710677, %v124_v8  ;;  %v127_v12 = vmul.f32 0.5, %v124_v8 }
  0xe8   :  { %175 = verf.f32 %v128_v10 }
  0xf5   :  { %v176_v11 = vpop.eup %175 }
  0xf6   :  { %v130_v13 = vadd.f32 1.0, %v176_v11 }
  0xf8   :  { %v131_v14 = vmul.f32 %v130_v13, %v127_v12 }
  0xfa   :  { %133 = vst.msk [vmem:[#allocation7] sm:$0xff] %vm132_vm2, %v131_v14 }
  0xfb   :  { %228 = shalt.err (!%p225_p0)
}
  0xfc   :  { %143 = dma.vmem_to_hbm [thread:$0]  %s141_s25, 128, %s285_s3, [#allocation4]  }
  0xfd   :  { %241 = dma.done.wait [#allocation4], 128  }
  0xfe   :  { %242 = vsyncadd [#allocation4], 4294967168 }
  0xff   :  { %147 = vsyncpa [#allocation3], 1 }
 0x100   :  { %148 = vsyncpa [#allocation6], 1 }
 0x101   :  { %149 = vsyncpa [#allocation4], 1 }

</bundles_post_ra>
